<compile_context>
chip_gen: v5e
topology: v5e:2x2
jax: 0.10.0
libtpu: 0.0.40
codegen_flags: <defaults>
</compile_context>

<pallas_src>
import functools

import jax
import jax.numpy as jnp
from jax.experimental import pallas as pl
from jax.experimental.pallas import tpu as pltpu


def _round_up(x, m):
    return ((x + m - 1) // m) * m


def _pad2d(a, rows, cols):
    r, c = a.shape
    if r == rows and c == cols:
        return a
    return jnp.pad(a, ((0, rows - r), (0, cols - c)))


def decoder_kernel(z_ref, w1_ref, b1_ref, w2_ref, b2_ref, out_ref, *, split):
    """out = tanh(z @ W1 + b1) @ W2 + b2 on one (rows, D_in) tile.

    When `split` is set the row tile is processed as two statically unrolled,
    independent halves so the LLO scheduler can overlap fc2's MXU matmul on
    half 0 with the EUP tanh of half 1.
    """
    rows = z_ref.shape[0]
    if split:
        half = rows // 2
        bounds = ((0, half), (half, rows - half))
    else:
        bounds = ((0, rows),)

    w1 = w1_ref[...]
    b1 = b1_ref[...]
    w2 = w2_ref[...]
    b2 = b2_ref[...]
    for r0, nr in bounds:
        h = jnp.dot(z_ref[pl.ds(r0, nr), :], w1,
                    preferred_element_type=jnp.float32)      # MXU, f32 acc
        h = jnp.tanh(h + b1)                                  # f32 VPU + EUP
        o = jnp.dot(h.astype(w2.dtype), w2,
                    preferred_element_type=jnp.float32)       # MXU, f32 acc
        out_ref[pl.ds(r0, nr), :] = (o + b2).astype(out_ref.dtype)


def prepare_decoder_params(w1, b1, w2, b2, *, compute_dtype=jnp.bfloat16):
    """Pad + cast the decoder parameters ONCE (not per forward call).

    Weights are stored as (in_features, out_features) — the transpose of
    nn.Linear's (out, in) — zero-padded so every matmul dim is a multiple of
    128 lanes, and cast to `compute_dtype` (bf16 by default). Biases stay f32.
    Returns (w1p, b1p, w2p, b2p).
    """
    d_in, hidden = w1.shape
    d_out = w2.shape[1]
    d_in_p = _round_up(d_in, 128)
    h_p = _round_up(hidden, 128)
    d_out_p = _round_up(d_out, 128)
    w1p = _pad2d(jnp.asarray(w1).astype(compute_dtype), d_in_p, h_p)
    b1p = _pad2d(jnp.asarray(b1, jnp.float32).reshape(1, -1), 1, h_p)
    w2p = _pad2d(jnp.asarray(w2).astype(compute_dtype), h_p, d_out_p)
    b2p = _pad2d(jnp.asarray(b2, jnp.float32).reshape(1, -1), 1, d_out_p)
    return w1p, b1p, w2p, b2p


@functools.partial(jax.jit, static_argnames=("d_out",))
def decoder_forward(z, w1p, b1p, w2p, b2p, *, d_out):
    """z: (B, D_in) with D_in <= w1p.shape[0]; params from prepare_decoder_params."""
    B, d_in = z.shape
    d_in_p, h_p = w1p.shape
    d_out_p = w2p.shape[1]
    assert d_in <= d_in_p, "z feature dim larger than prepared fc1 weight"

    out_dtype = z.dtype
    cdtype = w1p.dtype
    csize = jnp.dtype(cdtype).itemsize
    osize = jnp.dtype(out_dtype).itemsize
    if z.dtype != cdtype:
        z = z.astype(cdtype)

    # ---- batch tiling (all static: derived from shapes only) ----
    min_tile, target_tile = 128, 512
    b8 = _round_up(B, 8)
    use_grid = b8 >= 2 * min_tile
    if use_grid:
        # Even tile count balances v7x's two TensorCores; tile ~512 rows,
        # rounded to 8 sublanes so batch padding waste stays small.
        n_tiles = max(2, 2 * round(b8 / (2 * target_tile)))
        tile = _round_up(-(-b8 // n_tiles), 8)
        b_pad = tile * n_tiles
    else:
        n_tiles, tile, b_pad = 1, B, B     # no batch padding for single block
    split = tile >= 64 and tile % 16 == 0

    zp = _pad2d(z, b_pad, d_in_p)

    # ---- VMEM budget / resident-weight buffering ----
    wbytes = d_in_p * h_p * csize + h_p * d_out_p * csize
    big_weights = 2 * wbytes > (16 << 20)
    wbuf = 1 if big_weights else 2
    inbuf = 2 if use_grid else 1
    est = (inbuf * tile * d_in_p * csize            # z tile(s)
           + inbuf * tile * d_out_p * osize         # out tile(s)
           + (wbuf if use_grid else 1) * wbytes     # resident weights
           + 4 * (h_p + d_out_p) * 4                # biases (buffered)
           + tile * (h_p + d_out_p) * 4)            # f32 intermediates
    vmem_limit = int(min(100 << 20, max(32 << 20, 2 * est + (4 << 20))))

    kernel = functools.partial(decoder_kernel, split=split)
    out_shape = jax.ShapeDtypeStruct((b_pad, d_out_p), out_dtype)

    if not use_grid:
        # Single block: all operands resident in VMEM, no grid, no pipeline.
        out = pl.pallas_call(
            kernel,
            out_shape=out_shape,
            in_specs=[pl.BlockSpec(memory_space=pltpu.MemorySpace.VMEM)] * 5,
            out_specs=pl.BlockSpec(memory_space=pltpu.MemorySpace.VMEM),
            compiler_params=pltpu.CompilerParams(vmem_limit_bytes=vmem_limit),
        )(zp, w1p, b1p, w2p, b2p)
    else:
        # Batch tiled over a "parallel" grid axis (sharded across TCs on v7x);
        # weights/biases keep constant index_maps so they stay resident.
        def _const(shape):
            if big_weights:
                return pl.BlockSpec(shape, lambda i: (0, 0),
                                    pipeline_mode=pl.Buffered(1))
            return pl.BlockSpec(shape, lambda i: (0, 0))

        out = pl.pallas_call(
            kernel,
            out_shape=out_shape,
            grid=(n_tiles,),
            in_specs=[
                pl.BlockSpec((tile, d_in_p), lambda i: (i, 0)),
                _const((d_in_p, h_p)),
                _const((1, h_p)),
                _const((h_p, d_out_p)),
                _const((1, d_out_p)),
            ],
            out_specs=pl.BlockSpec((tile, d_out_p), lambda i: (i, 0)),
            compiler_params=pltpu.CompilerParams(
                dimension_semantics=("parallel",),
                vmem_limit_bytes=vmem_limit),
        )(zp, w1p, b1p, w2p, b2p)

    # Strip padding only if any was actually added.
    if out.shape != (B, d_out):
        out = out[:B, :d_out]
    return out


def init_params(key, d_in, hidden, d_out, dtype=jnp.float32):
    """Deterministic init mimicking nn.Linear's U(-1/sqrt(fan_in), 1/sqrt(fan_in))."""
    k1, k2, k3, k4 = jax.random.split(key, 4)
    lim1 = 1.0 / jnp.sqrt(d_in)
    lim2 = 1.0 / jnp.sqrt(hidden)
    w1 = jax.random.uniform(k1, (d_in, hidden), dtype, -lim1, lim1)
    b1 = jax.random.uniform(k2, (1, hidden), dtype, -lim1, lim1)
    w2 = jax.random.uniform(k3, (hidden, d_out), dtype, -lim2, lim2)
    b2 = jax.random.uniform(k4, (1, d_out), dtype, -lim2, lim2)
    return w1, b1, w2, b2


if __name__ == "__main__":
    # Small shapes consistent with the module's forward:
    # latent_num=4, latent_dim=8 -> d_in=32; hidden=32; output=64; batch=2.
    batch, latent_num, latent_dim, hidden, output = 2, 4, 8, 32, 64
    d_in = latent_num * latent_dim

    key = jax.random.PRNGKey(0)
    kz, kp, kz2 = jax.random.split(key, 3)
    z = jax.random.normal(kz, (batch, d_in), jnp.float32)
    w1, b1, w2, b2 = init_params(kp, d_in, hidden, output)
    ref = jnp.tanh(z @ w1 + b1) @ w2 + b2

    # 1) Exact f32 path (single-block, no grid).
    p32 = prepare_decoder_params(w1, b1, w2, b2, compute_dtype=jnp.float32)
    out32 = jax.block_until_ready(decoder_forward(z, *p32, d_out=output))
    assert out32.shape == (batch, output)
    assert jnp.allclose(out32, ref, atol=1e-5, rtol=1e-5)

    # 2) Default bf16 compute path (dtype-aware tolerance).
    pbf = prepare_decoder_params(w1, b1, w2, b2)
    outbf = jax.block_until_ready(decoder_forward(z, *pbf, d_out=output))
    assert outbf.shape == (batch, output)
    assert jnp.allclose(outbf, ref, atol=5e-2, rtol=5e-2)

    # 3) Larger batch exercises the batch-parallel grid path (2 row tiles).
    big_batch = 300
    zb = jax.random.normal(kz2, (big_batch, d_in), jnp.float32)
    refb = jnp.tanh(zb @ w1 + b1) @ w2 + b2
    outb = jax.block_until_ready(decoder_forward(zb, *p32, d_out=output))
    assert outb.shape == (big_batch, output)
    assert jnp.allclose(outb, refb, atol=1e-5, rtol=1e-5)

    print("KERNEL_OK")
</pallas_src>

<mosaic_0001>
module attributes {stable_mosaic.version = 11 : i64} {
  func.func @decoder_kernel(%arg0: memref<2x128xf32, #tpu.memory_space<vmem>>, %arg1: memref<128x128xf32, #tpu.memory_space<vmem>>, %arg2: memref<1x128xf32, #tpu.memory_space<vmem>>, %arg3: memref<128x128xf32, #tpu.memory_space<vmem>>, %arg4: memref<1x128xf32, #tpu.memory_space<vmem>>, %arg5: memref<2x128xf32, #tpu.memory_space<vmem>>) attributes {dimension_semantics = [], scalar_prefetch = 0 : i64, scratch_operands = 0 : i64, tpu.core_type = #tpu.core_type<tc>} {
    %c0 = arith.constant 0 : index
    %c0_0 = arith.constant 0 : index
    %0 = vector.load %arg1[%c0, %c0_0] : memref<128x128xf32, #tpu.memory_space<vmem>>, vector<128x128xf32>
    %c0_1 = arith.constant 0 : index
    %c0_2 = arith.constant 0 : index
    %1 = vector.load %arg2[%c0_1, %c0_2] : memref<1x128xf32, #tpu.memory_space<vmem>>, vector<1x128xf32>
    %c0_3 = arith.constant 0 : index
    %c0_4 = arith.constant 0 : index
    %2 = vector.load %arg3[%c0_3, %c0_4] : memref<128x128xf32, #tpu.memory_space<vmem>>, vector<128x128xf32>
    %c0_5 = arith.constant 0 : index
    %c0_6 = arith.constant 0 : index
    %3 = vector.load %arg4[%c0_5, %c0_6] : memref<1x128xf32, #tpu.memory_space<vmem>>, vector<1x128xf32>
    %c0_7 = arith.constant 0 : index
    %c0_8 = arith.constant 0 : index
    %4 = vector.load %arg0[%c0_7, %c0_8] : memref<2x128xf32, #tpu.memory_space<vmem>>, vector<2x128xf32>
    %cst = arith.constant dense<0.000000e+00> : vector<2x128xf32>
    %5 = tpu.matmul %4, %0, %cst {dimension_numbers = #tpu.dot_dimension_numbers<[1], [0], [0], [1], [0, 0, 1, 1], [], []>} : vector<2x128xf32>, vector<128x128xf32>, vector<2x128xf32> -> vector<2x128xf32>
    %6 = vector.broadcast %1 : vector<1x128xf32> to vector<2x128xf32>
    %7 = arith.addf %5, %6 : vector<2x128xf32>
    %8 = math.tanh %7 : vector<2x128xf32>
    %cst_9 = arith.constant dense<0.000000e+00> : vector<2x128xf32>
    %9 = tpu.matmul %8, %2, %cst_9 {dimension_numbers = #tpu.dot_dimension_numbers<[1], [0], [0], [1], [0, 0, 1, 1], [], []>} : vector<2x128xf32>, vector<128x128xf32>, vector<2x128xf32> -> vector<2x128xf32>
    %10 = vector.broadcast %3 : vector<1x128xf32> to vector<2x128xf32>
    %11 = arith.addf %9, %10 : vector<2x128xf32>
    %c0_10 = arith.constant 0 : index
    %c0_11 = arith.constant 0 : index
    %12 = vector.load %arg5[%c0_10, %c0_11] : memref<2x128xf32, #tpu.memory_space<vmem>>, vector<2x128xf32>
    tpu.vector_store %arg5[%c0_10, %c0_11], %11 {strides = array<i32>} : memref<2x128xf32, #tpu.memory_space<vmem>>, vector<2x128xf32>,
    return
  }
}

</mosaic_0001>

<bundles_post_ra>
// kernel: decoder_forward.1
= control target key start
LH: loop header
LB: loop body
LE: loop exit
PB: predicated region body
PF: predicated region fallthrough
CT: control target
= control target key end

     0   :  { %10 = vsyncpa [#allocation3], 0  ;;  %s294_s0 = inlined_call_operand.vmem [shape: f32[2,128], index: 0, kind: input, shape index: {}]   ;;  %s295_s1 = inlined_call_operand.hbm [shape: f32[128,128], index: 1, kind: input, shape index: {}]   ;;  %s296_s2 = inlined_call_operand.vmem [shape: f32[1,128], index: 2, kind: input, shape index: {}]   ;;  %s297_s3 = inlined_call_operand.hbm [shape: f32[128,128], index: 3, kind: input, shape index: {}]   ;;  %s298_s4 = inlined_call_operand.vmem [shape: f32[1,128], index: 4, kind: input, shape index: {}]   ;;  %s299_s5 = inlined_call_operand.hbm [shape: f32[2,128], index: 5, kind: output, shape index: {}]  }
   0x1   :  { %11 = vsyncpa [#allocation6], 0 }
   0x2   :  { %12 = vsyncpa [#allocation4], 0  ;;  %s19_s20 = sshll.u32 %s295_s1, 4  ;;  %s241_s21 = smov [#allocation2]   ;;  %s20_s20 = int_to_ptr.hbm [resolvable:$true] %s19_s20 }
   0x3   :  { %s21_s22 = sshll.u32 %s241_s21, 4  ;;  %s34_s25 = sshll.u32 %s297_s3, 4  ;;  %s22_s22 = int_to_ptr.vmem [resolvable:$true] %s21_s22  ;;  %s35_s25 = int_to_ptr.hbm [resolvable:$true] %s34_s25 }
   0x4   :  { %s242_s26 = smov 128   ;;  %s243_s27 = smov 8  }
   0x5   :  { %27 = dma.hbm_to_vmem [thread:$0]  %s20_s20, 2048, %s22_s22, [#allocation3], %s242_s26, %s242_s26, %s243_s27  }
   0x6   :  { %s244_s28 = smov [#allocation5]  }
   0x7   :  { %s36_s29 = sshll.u32 %s244_s28, 4  ;;  %s37_s29 = int_to_ptr.vmem [resolvable:$true] %s36_s29 }
   0x8   :  { %42 = dma.hbm_to_vmem [thread:$0]  %s35_s25, 2048, %s37_s29, [#allocation6], %s242_s26, %s242_s26, %s243_s27  }
   0x9   :  { %235 = dma.done.wait [#allocation3], 2048  }
   0xa   :  { %236 = vsyncadd [#allocation3], 4294965248 }
   0xb   :  { %237 = dma.done.wait [#allocation6], 2048  }
   0xc   :  { %238 = vsyncadd [#allocation6], 4294965248  ;;  %v68_v0 = vld [vmem:[#allocation2 + $0x78] sm:$0xff]  ;;  %v67_v1 = vld [vmem:[#allocation2 + $0x70] sm:$0xff]  ;;  %s245_s8 = smov [#allocation7]   ;;  %s143_s12 = sshll.u32 %s299_s5, 4  ;;  %s144_s12 = int_to_ptr.hbm [resolvable:$true] %s143_s12 }
   0xd   :  { %91 = vmatpush.msra.mxu0 %v68_v0  ;;  %v66_v2 = vld [vmem:[#allocation2 + $0x68] sm:$0xff]  ;;  %v65_v3 = vld [vmem:[#allocation2 + $0x60] sm:$0xff]  ;;  %v85_v4 = vld [vmem:[#allocation5 + $0x78] sm:$0xff]  ;;  %s141_s9 = sshll.u32 %s245_s8, 4  ;;  %s142_s9 = int_to_ptr.vmem [resolvable:$true] %s141_s9 }
   0xe   :  { %v64_v5 = vld [vmem:[#allocation2 + $0x58] sm:$0xff]  ;;  %115 = vmatpush.msra.mxu1 %v85_v4  ;;  %v84_v6 = vld [vmem:[#allocation5 + $0x70] sm:$0xff]  ;;  %v83_v7 = vld [vmem:[#allocation5 + $0x68] sm:$0xff] }
   0xf   :  { %92 = vmatpush.msra.mxu0 %v67_v1  ;;  %v63_v8 = vld [vmem:[#allocation2 + $0x50] sm:$0xff]  ;;  %v82_v9 = vld [vmem:[#allocation5 + $0x60] sm:$0xff]  ;;  %v62_v10 = vld [vmem:[#allocation2 + $0x48] sm:$0xff] }
  0x10   :  { %116 = vmatpush.msra.mxu1 %v84_v6  ;;  %v81_v11 = vld [vmem:[#allocation5 + $0x58] sm:$0xff]  ;;  %v61_v12 = vld [vmem:[#allocation2 + $0x40] sm:$0xff]  ;;  %v80_v13 = vld [vmem:[#allocation5 + $0x50] sm:$0xff] }
  0x11   :  { %93 = vmatpush.msra.mxu0 %v66_v2  ;;  %v60_v14 = vld [vmem:[#allocation2 + $0x38] sm:$0xff]  ;;  %v79_v15 = vld [vmem:[#allocation5 + $0x48] sm:$0xff]  ;;  %v59_v16 = vld [vmem:[#allocation2 + $0x30] sm:$0xff] }
  0x12   :  { %117 = vmatpush.msra.mxu1 %v83_v7  ;;  %v78_v17 = vld [vmem:[#allocation5 + $0x40] sm:$0xff]  ;;  %v58_v18 = vld [vmem:[#allocation2 + $0x28] sm:$0xff]  ;;  %v77_v19 = vld [vmem:[#allocation5 + $0x38] sm:$0xff] }
  0x13   :  { %94 = vmatpush.msra.mxu0 %v65_v3  ;;  %v57_v20 = vld [vmem:[#allocation2 + $0x20] sm:$0xff]  ;;  %v76_v21 = vld [vmem:[#allocation5 + $0x30] sm:$0xff]  ;;  %v56_v22 = vld [vmem:[#allocation2 + $0x18] sm:$0xff] }
  0x14   :  { %118 = vmatpush.msra.mxu1 %v82_v9  ;;  %v75_v23 = vld [vmem:[#allocation5 + $0x28] sm:$0xff]  ;;  %v55_v24 = vld [vmem:[#allocation2 + $0x10] sm:$0xff]  ;;  %v53_v26 = vld [vmem:[#allocation2] sm:$0xff] }
  0x15   :  { %95 = vmatpush.msra.mxu0 %v64_v5  ;;  %v54_v25 = vld [vmem:[#allocation2 + $0x8] sm:$0xff]  ;;  %v87_v27 = vld [vmem:[%s294_s0] sm:$0x3]  ;;  %v73_v29 = vld [vmem:[#allocation5 + $0x18] sm:$0xff] }
  0x16   :  { %119 = vmatpush.msra.mxu1 %v81_v11  ;;  %v74_v28 = vld [vmem:[#allocation5 + $0x20] sm:$0xff]  ;;  %v72_v30 = vld [vmem:[#allocation5 + $0x10] sm:$0xff]  ;;  %v71_v31 = vld [vmem:[#allocation5 + $0x8] sm:$0xff] }
  0x17   :  { %96 = vmatpush.msra.mxu0 %v63_v8  ;;  %v70_v32 = vld [vmem:[#allocation5] sm:$0xff] }
  0x18   :  { %120 = vmatpush.msra.mxu1 %v80_v13  ;;  %v159_v33 = vld [vmem:[%s296_s2] ss:$0 sm:$0xff] }
  0x19   :  { %97 = vmatpush.msra.mxu0 %v62_v10  ;;  %v160_v37 = vld [vmem:[%s298_s4] ss:$0 sm:$0xff] }
  0x1a   :  { %121 = vmatpush.msra.mxu1 %v79_v15 }
  0x1b   :  { %98 = vmatpush.msra.mxu0 %v61_v12 }
  0x1c   :  { %122 = vmatpush.msra.mxu1 %v78_v17 }
  0x1d   :  { %99 = vmatpush.msra.mxu0 %v60_v14 }
  0x1e   :  { %123 = vmatpush.msra.mxu1 %v77_v19 }
  0x1f   :  { %100 = vmatpush.msra.mxu0 %v59_v16 }
  0x20   :  { %124 = vmatpush.msra.mxu1 %v76_v21 }
  0x21   :  { %101 = vmatpush.msra.mxu0 %v58_v18 }
  0x22   :  { %125 = vmatpush.msra.mxu1 %v75_v23 }
  0x23   :  { %102 = vmatpush.msra.mxu0 %v57_v20 }
  0x24   :  { %126 = vmatpush.msra.mxu1 %v74_v28 }
  0x25   :  { %103 = vmatpush.msra.mxu0 %v56_v22 }
  0x26   :  { %127 = vmatpush.msra.mxu1 %v73_v29 }
  0x27   :  { %104 = vmatpush.msra.mxu0 %v55_v24 }
  0x28   :  { %128 = vmatpush.msra.mxu1 %v72_v30 }
  0x29   :  { %105 = vmatpush.msra.mxu0 %v54_v25 }
  0x2a   :  { %129 = vmatpush.msra.mxu1 %v71_v31 }
  0x2b   :  { %106 = vmatpush.msra.mxu0 %v53_v26 }
  0x2c   :  { %107 = vmatmul.f32.vlgmr.msra.gmra.mxu0 %v87_v27  ;;  %130 = vmatpush.msra.mxu1 %v70_v32 }
  0xa9   :  { %v108_v34 = vpop.f32.mrf.mxu0 }
  0xaa   :  { %v109_v35 = vadd.f32 %v159_v33, %v108_v34 }
  0xac   :  { %161 = vtanh.f32 %v109_v35 }
  0xb2   :  { %v162_v36 = vpop.eup %161 }
  0xb3   :  { %131 = vmatmul.f32.vlgmr.msra.gmra.mxu1 %v162_v36 }
 0x130   :  { %v132_v38 = vpop.f32.mrf.mxu1 }
 0x131   :  { %v133_v39 = vadd.f32 %v160_v37, %v132_v38 }
 0x133   :  { %135 = vst [vmem:[#allocation7] sm:$0x3] %v133_v39 }
 0x134   :  { %146 = dma.vmem_to_hbm [thread:$0]  %s142_s9, 32, %s144_s12, [#allocation4]  }
 0x135   :  { %239 = dma.done.wait [#allocation4], 32  }
 0x136   :  { %240 = vsyncadd [#allocation4], 4294967264 }
 0x137   :  { %151 = vsyncpa [#allocation3], 1 }
 0x138   :  { %152 = vsyncpa [#allocation6], 1 }
 0x139   :  { %153 = vsyncpa [#allocation4], 1 }

</bundles_post_ra>
